<compile_context>
chip_gen: v7x
topology: tpu7x:2x2x1
jax: 0.10.0
libtpu: 0.0.40
codegen_flags: <defaults>
</compile_context>

<pallas_src>
import functools

import jax
import jax.numpy as jnp
from jax.experimental import pallas as pl
from jax.experimental.pallas import tpu as pltpu

_LANE = 128      # lane width (last dim tiling)
_SUBLANE = 8     # f32 sublane count (second-to-last dim tiling)


def _round_up(x, m):
    return (x + m - 1) // m * m


def _critic_kernel(x_ref,
                   w1_ref, b1_ref,
                   w2_ref, b2_ref,
                   w3_ref, b3_ref,
                   w4_ref, b4_ref,
                   o_ref,
                   *, compute_dtype):
    # Fused 4-layer MLP hot path: 4 MXU matmuls + f32 bias adds + 3 ReLUs in VMEM.
    # Weights arrive already in compute_dtype (pre-cast once in the wrapper); only
    # the streamed x tile / activations are cast here (a no-op when f32).
    x = x_ref[...].astype(compute_dtype)

    h = jnp.dot(x, w1_ref[...], preferred_element_type=jnp.float32) + b1_ref[...]
    h = jnp.maximum(h, 0.0)

    h = jnp.dot(h.astype(compute_dtype), w2_ref[...],
                preferred_element_type=jnp.float32) + b2_ref[...]
    h = jnp.maximum(h, 0.0)

    h = jnp.dot(h.astype(compute_dtype), w3_ref[...],
                preferred_element_type=jnp.float32) + b3_ref[...]
    h = jnp.maximum(h, 0.0)

    q = jnp.dot(h.astype(compute_dtype), w4_ref[...],
                preferred_element_type=jnp.float32) + b4_ref[...]
    o_ref[...] = q.astype(o_ref.dtype)


@functools.partial(
    jax.jit,
    static_argnames=("batch_tile", "compute_dtype", "pad_output_lanes"))
def critic_forward(x, params, batch_tile=1024, compute_dtype=jnp.float32,
                   pad_output_lanes=False):
    """x: [B, state_size] float32. params: (w1,b1,w2,b2,w3,b3,w4,b4),
    weights [in, out], biases [1, out]. Returns q_values [B, action_size] f32.

    compute_dtype=jnp.bfloat16 halves operand traffic / ~2-4x MXU throughput on
    v6e/v7x (accumulation stays f32); default f32 keeps bit-level parity with the
    reference. pad_output_lanes=True keeps the lane-dense 128-wide output layout
    (prefer on v5e if masked partial stores regress).
    """
    (w1, b1, w2, b2, w3, b3, w4, b4) = params
    B, S = x.shape
    A = w4.shape[1]

    # --- pre-cast weights once (wrapper-side), not per grid step in-kernel ----
    if w1.dtype != compute_dtype:
        w1, w2, w3, w4 = (w.astype(compute_dtype) for w in (w1, w2, w3, w4))
    # Biases stay f32: they are added to the f32 MXU accumulator.

    # --- output layout --------------------------------------------------------
    A_out = A
    if pad_output_lanes:
        A_out = _round_up(A, _LANE)
        if A_out != A:
            w4 = jnp.pad(w4, ((0, 0), (0, A_out - A)))
            b4 = jnp.pad(b4, ((0, 0), (0, A_out - A)))

    # --- batch tiling ---------------------------------------------------------
    # Sublane-aligned tile, capped so the grid has >=2 steps whenever the batch
    # allows it (lets the "parallel" axis shard across both v7x TensorCores; per
    # extra step overhead is ~0.35us, negligible).
    B_aligned = _round_up(B, _SUBLANE)
    half = _round_up(pl.cdiv(B_aligned, 2), _SUBLANE)
    bt = max(_SUBLANE, min(batch_tile, B_aligned, half))
    B_pad = _round_up(B, bt)
    if B_pad != B:
        x = jnp.pad(x, ((0, B_pad - B), (0, 0)))

    grid = (B_pad // bt,)

    def resident(arr):
        # Full-array block, constant index_map -> DMA'd once, VMEM-resident.
        # (pipeline_mode=pl.Buffered(1) would also drop the second buffer, but the
        #  constant index_map already avoids any re-DMA, so we keep the default.)
        nd = arr.ndim
        return pl.BlockSpec(arr.shape, lambda i, _nd=nd: (0,) * _nd)

    kernel = functools.partial(_critic_kernel, compute_dtype=compute_dtype)

    out = pl.pallas_call(
        kernel,
        out_shape=jax.ShapeDtypeStruct((B_pad, A_out), jnp.float32),
        grid=grid,
        in_specs=[
            # Streamed x tile; last block dim equals the full state dim, so no
            # 128-lane padding of x is required.
            pl.BlockSpec((bt, S), lambda i: (i, 0)),
            resident(w1), resident(b1),
            resident(w2), resident(b2),
            resident(w3), resident(b3),
            resident(w4), resident(b4),
        ],
        out_specs=pl.BlockSpec((bt, A_out), lambda i: (i, 0)),
        compiler_params=pltpu.CompilerParams(
            dimension_semantics=("parallel",)),
    )(x, w1, b1, w2, b2, w3, b3, w4, b4)

    if B_pad != B:
        out = out[:B]
    if A_out != A:
        out = out[:, :A]
    return out


def init_critic_params(key, state_size, action_size, hidden_size=128):
    """Deterministic synthetic init (uniform, scaled like PyTorch's default)."""
    dims = [(state_size, hidden_size),
            (hidden_size, hidden_size),
            (hidden_size, hidden_size),
            (hidden_size, action_size)]
    params = []
    for (fan_in, fan_out) in dims:
        key, kw, kb = jax.random.split(key, 3)
        bound = 1.0 / jnp.sqrt(fan_in)
        w = jax.random.uniform(kw, (fan_in, fan_out), jnp.float32, -bound, bound)
        b = jax.random.uniform(kb, (1, fan_out), jnp.float32, -bound, bound)
        params.extend([w, b])
    return tuple(params)


def critic_reference(x, params):
    (w1, b1, w2, b2, w3, b3, w4, b4) = params
    h = jnp.maximum(x @ w1 + b1, 0.0)
    h = jnp.maximum(h @ w2 + b2, 0.0)
    h = jnp.maximum(h @ w3 + b3, 0.0)
    return h @ w4 + b4


if __name__ == "__main__":
    key = jax.random.PRNGKey(0)
    batch, state_size, action_size, hidden_size = 16, 32, 4, 128

    kx, kp = jax.random.split(key)
    x = jax.random.normal(kx, (batch, state_size), jnp.float32)
    params = init_critic_params(kp, state_size, action_size, hidden_size)
    q_ref = critic_reference(x, params)

    # Default f32 path: exact-width output, no x padding, 2-step parallel grid.
    q = jax.block_until_ready(critic_forward(x, params))
    assert q.shape == (batch, action_size)
    assert jnp.allclose(q, q_ref, atol=1e-5, rtol=1e-5), "mismatch vs reference"

    # Lane-dense (padded-A) output variant — the v5e fallback layout.
    q_pad = jax.block_until_ready(critic_forward(x, params, pad_output_lanes=True))
    assert jnp.allclose(q_pad, q_ref, atol=1e-5, rtol=1e-5), "mismatch (padded-A)"

    # bf16-operand path (weights pre-cast once in the wrapper, f32 accumulation):
    # the fast MXU path on v6e/v7x; looser tolerance since activations round to bf16.
    q_bf16 = jax.block_until_ready(
        critic_forward(x, params, compute_dtype=jnp.bfloat16))
    assert jnp.allclose(q_bf16, q_ref, atol=5e-2, rtol=5e-2), "mismatch (bf16) vs reference"

    print("KERNEL_OK")
</pallas_src>

<mosaic_0001>
module attributes {stable_mosaic.version = 11 : i64} {
  func.func @_critic_kernel(%arg0: i32, %arg1: memref<8x32xf32, #tpu.memory_space<vmem>>, %arg2: memref<32x128xf32, #tpu.memory_space<vmem>>, %arg3: memref<1x128xf32, #tpu.memory_space<vmem>>, %arg4: memref<128x128xf32, #tpu.memory_space<vmem>>, %arg5: memref<1x128xf32, #tpu.memory_space<vmem>>, %arg6: memref<128x128xf32, #tpu.memory_space<vmem>>, %arg7: memref<1x128xf32, #tpu.memory_space<vmem>>, %arg8: memref<128x4xf32, #tpu.memory_space<vmem>>, %arg9: memref<1x4xf32, #tpu.memory_space<vmem>>, %arg10: memref<8x4xf32, #tpu.memory_space<vmem>>) attributes {dimension_semantics = [#tpu.dimension_semantics<parallel>], iteration_bounds = array<i64: 2>, scalar_prefetch = 0 : i64, scratch_operands = 0 : i64, tpu.core_type = #tpu.core_type<tc>, window_params = [{transform_indices = @transform_0, window_bounds = array<i64: 8, 32>}, {pipeline_mode = #tpu.pipeline_mode<synchronous>, transform_indices = @transform_1, window_bounds = array<i64: 32, 128>}, {pipeline_mode = #tpu.pipeline_mode<synchronous>, transform_indices = @transform_2, window_bounds = array<i64: 1, 128>}, {pipeline_mode = #tpu.pipeline_mode<synchronous>, transform_indices = @transform_3, window_bounds = array<i64: 128, 128>}, {pipeline_mode = #tpu.pipeline_mode<synchronous>, transform_indices = @transform_4, window_bounds = array<i64: 1, 128>}, {pipeline_mode = #tpu.pipeline_mode<synchronous>, transform_indices = @transform_5, window_bounds = array<i64: 128, 128>}, {pipeline_mode = #tpu.pipeline_mode<synchronous>, transform_indices = @transform_6, window_bounds = array<i64: 1, 128>}, {pipeline_mode = #tpu.pipeline_mode<synchronous>, transform_indices = @transform_7, window_bounds = array<i64: 128, 4>}, {pipeline_mode = #tpu.pipeline_mode<synchronous>, transform_indices = @transform_8, window_bounds = array<i64: 1, 4>}, {transform_indices = @transform_9, window_bounds = array<i64: 8, 4>}]} {
    %c0 = arith.constant 0 : index
    %c0_0 = arith.constant 0 : index
    %0 = vector.load %arg1[%c0, %c0_0] : memref<8x32xf32, #tpu.memory_space<vmem>>, vector<8x32xf32>
    %c0_1 = arith.constant 0 : index
    %c0_2 = arith.constant 0 : index
    %1 = vector.load %arg2[%c0_1, %c0_2] : memref<32x128xf32, #tpu.memory_space<vmem>>, vector<32x128xf32>
    %cst = arith.constant dense<0.000000e+00> : vector<8x128xf32>
    %2 = tpu.matmul %0, %1, %cst {dimension_numbers = #tpu.dot_dimension_numbers<[1], [0], [0], [1], [0, 0, 1, 1], [], []>} : vector<8x32xf32>, vector<32x128xf32>, vector<8x128xf32> -> vector<8x128xf32>
    %c0_3 = arith.constant 0 : index
    %c0_4 = arith.constant 0 : index
    %3 = vector.load %arg3[%c0_3, %c0_4] : memref<1x128xf32, #tpu.memory_space<vmem>>, vector<1x128xf32>
    %4 = vector.broadcast %3 : vector<1x128xf32> to vector<8x128xf32>
    %5 = arith.addf %2, %4 : vector<8x128xf32>
    %cst_5 = arith.constant 0.000000e+00 : f32
    %6 = vector.broadcast %cst_5 : f32 to vector<8x128xf32>
    %7 = arith.maximumf %5, %6 : vector<8x128xf32>
    %c0_6 = arith.constant 0 : index
    %c0_7 = arith.constant 0 : index
    %8 = vector.load %arg4[%c0_6, %c0_7] : memref<128x128xf32, #tpu.memory_space<vmem>>, vector<128x128xf32>
    %cst_8 = arith.constant dense<0.000000e+00> : vector<8x128xf32>
    %9 = tpu.matmul %7, %8, %cst_8 {dimension_numbers = #tpu.dot_dimension_numbers<[1], [0], [0], [1], [0, 0, 1, 1], [], []>} : vector<8x128xf32>, vector<128x128xf32>, vector<8x128xf32> -> vector<8x128xf32>
    %c0_9 = arith.constant 0 : index
    %c0_10 = arith.constant 0 : index
    %10 = vector.load %arg5[%c0_9, %c0_10] : memref<1x128xf32, #tpu.memory_space<vmem>>, vector<1x128xf32>
    %11 = vector.broadcast %10 : vector<1x128xf32> to vector<8x128xf32>
    %12 = arith.addf %9, %11 : vector<8x128xf32>
    %cst_11 = arith.constant 0.000000e+00 : f32
    %13 = vector.broadcast %cst_11 : f32 to vector<8x128xf32>
    %14 = arith.maximumf %12, %13 : vector<8x128xf32>
    %c0_12 = arith.constant 0 : index
    %c0_13 = arith.constant 0 : index
    %15 = vector.load %arg6[%c0_12, %c0_13] : memref<128x128xf32, #tpu.memory_space<vmem>>, vector<128x128xf32>
    %cst_14 = arith.constant dense<0.000000e+00> : vector<8x128xf32>
    %16 = tpu.matmul %14, %15, %cst_14 {dimension_numbers = #tpu.dot_dimension_numbers<[1], [0], [0], [1], [0, 0, 1, 1], [], []>} : vector<8x128xf32>, vector<128x128xf32>, vector<8x128xf32> -> vector<8x128xf32>
    %c0_15 = arith.constant 0 : index
    %c0_16 = arith.constant 0 : index
    %17 = vector.load %arg7[%c0_15, %c0_16] : memref<1x128xf32, #tpu.memory_space<vmem>>, vector<1x128xf32>
    %18 = vector.broadcast %17 : vector<1x128xf32> to vector<8x128xf32>
    %19 = arith.addf %16, %18 : vector<8x128xf32>
    %cst_17 = arith.constant 0.000000e+00 : f32
    %20 = vector.broadcast %cst_17 : f32 to vector<8x128xf32>
    %21 = arith.maximumf %19, %20 : vector<8x128xf32>
    %c0_18 = arith.constant 0 : index
    %c0_19 = arith.constant 0 : index
    %22 = vector.load %arg8[%c0_18, %c0_19] : memref<128x4xf32, #tpu.memory_space<vmem>>, vector<128x4xf32>
    %cst_20 = arith.constant dense<0.000000e+00> : vector<8x4xf32>
    %23 = tpu.matmul %21, %22, %cst_20 {dimension_numbers = #tpu.dot_dimension_numbers<[1], [0], [0], [1], [0, 0, 1, 1], [], []>} : vector<8x128xf32>, vector<128x4xf32>, vector<8x4xf32> -> vector<8x4xf32>
    %c0_21 = arith.constant 0 : index
    %c0_22 = arith.constant 0 : index
    %24 = vector.load %arg9[%c0_21, %c0_22] : memref<1x4xf32, #tpu.memory_space<vmem>>, vector<1x4xf32>
    %25 = vector.broadcast %24 : vector<1x4xf32> to vector<8x4xf32>
    %26 = arith.addf %23, %25 : vector<8x4xf32>
    %c0_23 = arith.constant 0 : index
    %c0_24 = arith.constant 0 : index
    %27 = vector.load %arg10[%c0_23, %c0_24] : memref<8x4xf32, #tpu.memory_space<vmem>>, vector<8x4xf32>
    tpu.vector_store %arg10[%c0_23, %c0_24], %26 {strides = array<i32>} : memref<8x4xf32, #tpu.memory_space<vmem>>, vector<8x4xf32>,
    return
  }
  func.func @transform_0(%arg0: i32) -> (i32, i32) {
    %c0_i32 = arith.constant 0 : i32
    %c0_i32_0 = arith.constant 0 : i32
    return %arg0, %c0_i32 : i32, i32
  }
  func.func @transform_1(%arg0: i32) -> (i32, i32) {
    %c0_i32 = arith.constant 0 : i32
    %c0_i32_0 = arith.constant 0 : i32
    %c0_i32_1 = arith.constant 0 : i32
    return %c0_i32, %c0_i32_0 : i32, i32
  }
  func.func @transform_2(%arg0: i32) -> (i32, i32) {
    %c0_i32 = arith.constant 0 : i32
    %c0_i32_0 = arith.constant 0 : i32
    %c0_i32_1 = arith.constant 0 : i32
    return %c0_i32, %c0_i32_0 : i32, i32
  }
  func.func @transform_3(%arg0: i32) -> (i32, i32) {
    %c0_i32 = arith.constant 0 : i32
    %c0_i32_0 = arith.constant 0 : i32
    %c0_i32_1 = arith.constant 0 : i32
    return %c0_i32, %c0_i32_0 : i32, i32
  }
  func.func @transform_4(%arg0: i32) -> (i32, i32) {
    %c0_i32 = arith.constant 0 : i32
    %c0_i32_0 = arith.constant 0 : i32
    %c0_i32_1 = arith.constant 0 : i32
    return %c0_i32, %c0_i32_0 : i32, i32
  }
  func.func @transform_5(%arg0: i32) -> (i32, i32) {
    %c0_i32 = arith.constant 0 : i32
    %c0_i32_0 = arith.constant 0 : i32
    %c0_i32_1 = arith.constant 0 : i32
    return %c0_i32, %c0_i32_0 : i32, i32
  }
  func.func @transform_6(%arg0: i32) -> (i32, i32) {
    %c0_i32 = arith.constant 0 : i32
    %c0_i32_0 = arith.constant 0 : i32
    %c0_i32_1 = arith.constant 0 : i32
    return %c0_i32, %c0_i32_0 : i32, i32
  }
  func.func @transform_7(%arg0: i32) -> (i32, i32) {
    %c0_i32 = arith.constant 0 : i32
    %c0_i32_0 = arith.constant 0 : i32
    %c0_i32_1 = arith.constant 0 : i32
    return %c0_i32, %c0_i32_0 : i32, i32
  }
  func.func @transform_8(%arg0: i32) -> (i32, i32) {
    %c0_i32 = arith.constant 0 : i32
    %c0_i32_0 = arith.constant 0 : i32
    %c0_i32_1 = arith.constant 0 : i32
    return %c0_i32, %c0_i32_0 : i32, i32
  }
  func.func @transform_9(%arg0: i32) -> (i32, i32) {
    %c0_i32 = arith.constant 0 : i32
    %c0_i32_0 = arith.constant 0 : i32
    return %arg0, %c0_i32 : i32, i32
  }
}

</mosaic_0001>

<bundles_post_ra>
// kernel: critic_forward.1
= control target key start
LH: loop header
LB: loop body
LE: loop exit
PB: predicated region body
PF: predicated region fallthrough
CT: control target
= control target key end

     0   :  { %14 = vsyncpa [#allocation3], 0  ;;  %s1668_s0 = inlined_call_operand.hbm [shape: f32[16,32], index: 0, kind: input, shape index: {}]   ;;  %s1669_s1 = inlined_call_operand.hbm [shape: f32[32,128], index: 1, kind: input, shape index: {}]   ;;  %s1670_s2 = inlined_call_operand.vmem [shape: f32[1,128], index: 2, kind: input, shape index: {}]   ;;  %s1671_s3 = inlined_call_operand.vmem [shape: f32[128,128], index: 3, kind: input, shape index: {}]   ;;  %s1672_s4 = inlined_call_operand.vmem [shape: f32[1,128], index: 4, kind: input, shape index: {}]   ;;  %s1673_s5 = inlined_call_operand.hbm [shape: f32[128,128], index: 5, kind: input, shape index: {}]   ;;  %s1674_s6 = inlined_call_operand.vmem [shape: f32[1,128], index: 6, kind: input, shape index: {}]   ;;  %s1675_s7 = inlined_call_operand.vmem [shape: f32[128,4], index: 7, kind: input, shape index: {}]   ;;  %s1676_s8 = inlined_call_operand.vmem [shape: f32[1,4], index: 8, kind: input, shape index: {}]   ;;  %s1677_s9 = inlined_call_operand.vmem [shape: f32[16,4], index: 9, kind: output, shape index: {}]  }
   0x1   :  { %16 = vsyncpa [#allocation3 + $0x1], 0 }
   0x2   :  { %17 = vsyncpa [#allocation5], 0  ;;  %s1349_s30 = smov 0   ;;  %s1351_s10 = smov 0  }
   0x3   :  { %s1353_s11 = smov 0   ;;  %s1355_s12 = smov 0  }
   0x4 LB: > { %s1368_s13 = sadd.s32 4294967295, %s1289_s12   ;;  %p43_p0 = scmp.ne.s32.totalorder %s1281_s10, %s1277_s30  ;;  %s1289_s12 = sphi %s1355_s12, %s1692_s12   ;;  %s1285_s11 = sphi %s1353_s11, %s1691_s11   ;;  %s1281_s10 = sphi %s1351_s10, %s1690_s10   ;;  %s1277_s30 = sphi %s1349_s30, %s1689_s30  }
   0x5   : > { %p1678_p1 = scmp.eq.s32.totalorder %s1368_s13, 0  ;;  %p832_p2 = scmp.ge.s32.totalorder %s1289_s12, 1 }
   0x6   : > { %p248_p3 = scmp.lt.s32.totalorder %s1289_s12, 3  ;;  %s1291_s16 = smov [#allocation4]  }
   0x7   : > { %p1376_p4 = por %p1678_p1, %p43_p0  ;;  %s260_s17 = sshll.u32 %s1291_s16, 4  ;;  %s261_s17 = int_to_ptr.vmem [resolvable:$true] %s260_s17 }
   0x8   : > { %p1380_p5 = pnand %p832_p2, %p248_p3  ;;  %s1292_s19 = smov [#allocation6]  }
   0x9   : > { %s1681_s14 = scalar_select %p1376_p4, 1, 0 }
   0xa   : > { %s1682_s15 = scalar_select %p1380_p5, 1, 0 }
   0xb   : > { %p1110_p6 = pneg %p1380_p5  ;;  %s282_s20 = sshll.u32 %s1292_s19, 4  ;;  %s1392_s20 = int_to_ptr.vmem [resolvable:$true] %s282_s20 }
   0xc   : > { %s1165_s23 = scalar_lea.hbm %s1669_s1, 512 }
   0xd   : > { %p1388_p7 = pnand %p1110_p6, %p1678_p1  ;;  %p1166_p8 = scmp.ne.s32.totalorder %s1669_s1, %s1165_s23 }
   0xe   : > { %p1172_p12 = scmp.lt.u32.totalorder %s1165_s23, %s1669_s1 }
   0xf   : > { %p1167_p9 = pneg %p1388_p7 }
  0x11   : > { %p1168_p10 = pnand %p1167_p9, %p1166_p8 }
  0x13   : > { %p1169_p11 = pneg %p1168_p10 }
  0x15   : > { %p1174_p13 = pnand %p1172_p12, %p1169_p11 }
  0x17   : > { %1177 = shalt.err (!%p1174_p13)
}
  0x18   : > { %s1178_s28 = scalar_lea.vmem %s261_s17, 512  ;;  %p1186_p6 = scmp.lt.s32.totalorder %s261_s17, %s261_s17 }
  0x19   : > { %p1179_p0 = scmp.ne.s32.totalorder %s261_s17, %s1178_s28  ;;  %p1187_p1 = scmp.lt.s32.totalorder %s1178_s28, %s1178_s28 }
  0x1b   : > { %p1181_p2 = pnand %p1179_p0, %p1167_p9  ;;  %p1188_p4 = por %p1187_p1, %p1186_p6 }
  0x1d   : > { %p1182_p3 = pneg %p1181_p2 }
  0x1f   : > { %p1189_p5 = pnand %p1188_p4, %p1182_p3 }
  0x21   : > { %1192 = shalt.err (!%p1189_p5)
}
  0x22   : > { %s1293_s29 = smov 128   ;;  %s1294_s30 = smov 8  }
  0x23   : > { %1113 = dma.hbm_to_vmem [thread:$0]  (!%p1388_p7), %s1669_s1, 512, %s261_s17, [#allocation5], %s1293_s29, %s1293_s29, %s1294_s30  }
  0x24   : > { %s1193_s23 = scalar_lea.hbm %s1673_s5, 2048 }
  0x25   : > { %p1194_p8 = scmp.ne.s32.totalorder %s1673_s5, %s1193_s23  ;;  %p1200_p5 = scmp.lt.u32.totalorder %s1193_s23, %s1673_s5 }
  0x27   : > { %p1196_p1 = pnand %p1194_p8, %p1167_p9 }
  0x29   : > { %p1197_p4 = pneg %p1196_p1 }
  0x2b   : > { %p1202_p10 = pnand %p1200_p5, %p1197_p4 }
  0x2d   : > { %1205 = shalt.err (!%p1202_p10)
}
  0x2e   : > { %s1206_s17 = scalar_lea.vmem %s1392_s20, 2048  ;;  %p1214_p0 = scmp.lt.s32.totalorder %s1392_s20, %s1392_s20 }
  0x2f   : > { %p1207_p11 = scmp.ne.s32.totalorder %s1392_s20, %s1206_s17  ;;  %p1215_p2 = scmp.lt.s32.totalorder %s1206_s17, %s1206_s17 }
  0x31   : > { %p1209_p12 = pnand %p1207_p11, %p1167_p9  ;;  %p1216_p3 = por %p1215_p2, %p1214_p0 }
  0x33   : > { %p1210_p13 = pneg %p1209_p12 }
  0x35   : > { %p1217_p6 = pnand %p1216_p3, %p1210_p13 }
  0x37   : > { %1220 = shalt.err (!%p1217_p6)
}
  0x38   : > { %1116 = dma.hbm_to_vmem [thread:$0]  (!%p1388_p7), %s1673_s5, 2048, %s1392_s20, [#allocation5], %s1293_s29, %s1293_s29, %s1294_s30  }
  0x39   : > { %s1442_s19 = sadd.s32 1, %s1289_s12   ;;  %s30_s21 = sadd.s32 1, %s1285_s11 }
  0x3a   : > { %s27_s18 = ssub.s32 %s1289_s12, %s1442_s19  ;;  %p37_p9 = scmp.ne.s32.totalorder %s1285_s11, %s1281_s10 }
  0x3b   : > { %p28_p8 = scmp.eq.s32.totalorder %s27_s18, 0  ;;  %p38_p1 = scmp.eq.s32.totalorder %s1289_s12, 0 }
  0x3c   : > { %p1123_p4 = scmp.lt.s32.totalorder %s1289_s12, 2  ;;  %s305_s22 = sand.u32 1, %s1285_s11  }
  0x3d   : > { %s1453_s23 = scalar_select %p28_p8, %s1285_s11, %s30_s21  }
  0x3e   : > { %p39_p5 = por %p38_p1, %p37_p9  ;;  %s836_s24 = sshll.u32 %s305_s22, 3 }
  0x3f   : > { %s837_s25 = sshll.u32 %s1289_s12, 7  ;;  %s309_s20 = scalar_lea.vmem [#allocation2], %s836_s24 }
  0x40   : > { %s1459_s17 = scalar_lea.hbm %s1668_s0, %s837_s25  ;;  %s316_s29 = sshll.u32 %s309_s20, 4  ;;  %s1465_s29 = int_to_ptr.vmem [resolvable:$true] %s316_s29 }
  0x41   : > { %p1461_p7 = pnand %p1123_p4, %p39_p5  ;;  %s306_s12 = scalar_lea.sflag [#allocation3], %s305_s22 }
  0x42   : > { %s1221_s28 = scalar_lea.hbm %s1459_s17, 128  ;;  %s1226_s18 = scalar_lea.hbm %s1668_s0, 256 }
  0x43   : > { %p1222_p10 = scmp.ne.s32.totalorder %s1459_s17, %s1221_s28  ;;  %p1223_p11 = pneg %p1461_p7 }
  0x44   : > { %p1227_p0 = scmp.lt.u32.totalorder %s1459_s17, %s1668_s0  ;;  %p1228_p2 = scmp.lt.u32.totalorder %s1226_s18, %s1221_s28 }
  0x45   : > { %p1224_p12 = pnand %p1223_p11, %p1222_p10  ;;  %p1230_p6 = scmp.lt.u32.totalorder %s1221_s28, %s1459_s17 }
  0x46   : > { %p1229_p3 = por %p1228_p2, %p1227_p0 }
  0x47   : > { %p1225_p13 = pneg %p1224_p12 }
  0x48   : > { %p1231_p9 = por %p1230_p6, %p1229_p3 }
  0x4a   : > { %p1232_p8 = pnand %p1231_p9, %p1225_p13 }
  0x4c   : > { %1235 = shalt.err (!%p1232_p8)
}
  0x4d   : > { %s1236_s22 = scalar_lea.vmem %s1465_s29, 128  ;;  %s1295_s26 = smov [#allocation2]  }
  0x4e   : > { %p1237_p1 = scmp.ne.s32.totalorder %s1465_s29, %s1236_s22  ;;  %s1241_s27 = sshll.u32 %s1295_s26, 4  ;;  %s1242_s27 = int_to_ptr.vmem [resolvable:$false] %s1241_s27 }
  0x4f   : > { %s1243_s20 = scalar_lea.vmem %s1242_s27, 256  ;;  %p1244_p10 = scmp.lt.s32.totalorder %s1465_s29, %s1242_s27 }
  0x50   : > { %p1239_p4 = pnand %p1237_p1, %p1223_p11  ;;  %p1245_p12 = scmp.lt.s32.totalorder %s1243_s20, %s1236_s22 }
  0x52   : > { %p1240_p5 = pneg %p1239_p4  ;;  %p1246_p0 = por %p1245_p12, %p1244_p10 }
  0x54   : > { %p1247_p2 = pnand %p1246_p0, %p1240_p5 }
  0x56   : > { %1250 = shalt.err (!%p1247_p2)
}
  0x57   : > { %1120 = dma.hbm_to_vmem [thread:$0]  (!%p1461_p7), %s1459_s17, 128, %s1465_s29, %s306_s12  }
  0x58   : > { %p1685_p13 = scmp.ne.s32.totalorder %s1682_s15, 0 }
  0x59   : > { %s327_s28 = sand.u32 (!%p1685_p13), 1, %s1281_s10   ;;  %p1686_p11 = scmp.ne.s32.totalorder (!%p1685_p13), %s1681_s14, 0 }
  0x5a   : > { %325 = sbr.rel (%p1685_p13) target bundleno = 974 (0x3ce), region = 56  ;;  %s1495_s16 = sshll.u32 (!%p1685_p13), %s327_s28, 3 }
  0x5b   : > { %s328_s21 = scalar_lea.sflag (!%p1685_p13), [#allocation3], %s327_s28  ;;  %s331_s18 = scalar_lea.vmem (!%p1685_p13), [#allocation2], %s1495_s16 }
  0x61   : > { %1268 = dma.done.wait (%p1686_p11), %s328_s21, 128  }
  0x62   : > { %1270 = vsyncadd (%p1686_p11), %s328_s21, 4294967168  ;;  %p1687_p3 = scmp.eq.s32.totalorder %s1368_s13, 0 }
  0x64   : > { %1272 = dma.done.wait (%p1687_p3), [#allocation5], 2560   ;;  %p1688_p7 = pmov %p1687_p3 }
  0x65   : > { %v1296_v0 = vmov 0.0|0.0   ;;  %vm1297_vm0 = vmmov 0   ;;  %v1298_v1 = vmov 0.0   ;;  %v378_v2 = vld [vmem:[#allocation4] sm:$0xff]  ;;  %v379_v3 = vld [vmem:[#allocation4 + $0x8] sm:$0xff]  ;;  %v380_v4 = vld [vmem:[#allocation4 + $0x10] sm:$0xff] }
  0x66   : > { %1274 = vsyncadd (%p1688_p7), [#allocation5], 4294964736  ;;  %1022 = vmatprep.subr.bf16.mxu0 %v1296_v0  ;;  %914 = vmatprep.mubr.msk.f32.mxu0 %vm1297_vm0, %v1298_v1  ;;  %v1023_v5 = vpack.c.bf16 %v379_v3, %v378_v2  ;;  %v381_v6 = vld [vmem:[#allocation4 + $0x18] sm:$0xff]  ;;  %v464_v7 = vld [vmem:[%s1671_s3] sm:$0xff]  ;;  %vm389_vm1 = vcmask 261120   ;;  %p373_p6 = scmp.lt.s32.totalorder %s1368_s13, 1 }
  0x67   : > { %1028 = vmatprep.subr.bf16.mxu1 %v1296_v0  ;;  %949 = vmatprep.mubr.msk.f32.mxu1 %vm1297_vm0, %v1298_v1  ;;  %v465_v8 = vld [vmem:[%s1671_s3 + $0x8] sm:$0xff]  ;;  %v466_v9 = vld [vmem:[%s1671_s3 + $0x10] sm:$0xff]  ;;  %v467_v10 = vld [vmem:[%s1671_s3 + $0x18] sm:$0xff]  ;;  %v1026_v11 = vpack.c.bf16 %v381_v6, %v380_v4  ;;  %vm745_vm2 = vcmask 31744  }
  0x68   : > { %1024 = vmatpush3.bf16.msra.mxu0 %v1023_v5  ;;  %v1029_v12 = vpack.c.bf16 %v465_v8, %v464_v7  ;;  %v1032_v13 = vpack.c.bf16 %v467_v10, %v466_v9  ;;  %v468_v14 = vld [vmem:[%s1671_s3 + $0x20] sm:$0xff]  ;;  %v469_v15 = vld [vmem:[%s1671_s3 + $0x28] sm:$0xff]  ;;  %v470_v18 = vld [vmem:[%s1671_s3 + $0x30] sm:$0xff]  ;;  %s1694_s13 = smov (!%p373_p6, %s1368_s13), 1 }
  0x69   : > { %1025 = vmatprep.subr.bf16.mxu0 %v1296_v0  ;;  %v377_v16 = vld [vmem:[%s331_s18] sm:$0xff]  ;;  %v1035_v17 = vpack.c.bf16 %v469_v15, %v468_v14  ;;  %v471_v19 = vld [vmem:[%s1671_s3 + $0x38] sm:$0xff]  ;;  %v474_v24 = vld [vmem:[%s1671_s3 + $0x50] sm:$0xff]  ;;  %s842_s24 = sshll.u32 %s1694_s13, 3 }
  0x6a   : > { %1030 = vmatpush3.bf16.msra.mxu1 %v1029_v12  ;;  %v1038_v20 = vpack.c.bf16 %v471_v19, %v470_v18  ;;  %v472_v21 = vld [vmem:[%s1671_s3 + $0x40] sm:$0xff]  ;;  %v473_v22 = vld [vmem:[%s1671_s3 + $0x48] sm:$0xff]  ;;  %v475_v25 = vld [vmem:[%s1671_s3 + $0x58] sm:$0xff]  ;;  %s376_s20 = scalar_lea.vmem %s1677_s9, %s842_s24 }
  0x6b   : > { %1031 = vmatprep.subr.bf16.mxu1 %v1296_v0  ;;  %v1041_v23 = vpack.c.bf16 %v473_v22, %v472_v21  ;;  %v1044_v26 = vpack.c.bf16 %v475_v25, %v474_v24  ;;  %v476_v27 = vld [vmem:[%s1671_s3 + $0x60] sm:$0xff]  ;;  %v477_v28 = vld [vmem:[%s1671_s3 + $0x68] sm:$0xff]  ;;  %v478_v30 = vld [vmem:[%s1671_s3 + $0x70] sm:$0xff] }
  0x6c   : > { %1027 = vmatpush3.bf16.msra.mxu0 %v1026_v11  ;;  %v1047_v29 = vpack.c.bf16 %v477_v28, %v476_v27  ;;  %v479_v31 = vld [vmem:[%s1671_s3 + $0x78] sm:$0xff]  ;;  %v558_v33 = vld [vmem:[#allocation6] sm:$0xff]  ;;  %v560_v35 = vld [vmem:[#allocation6 + $0x10] sm:$0xff] }
  0x6d   : > { %1052 = vmatprep.subr.bf16.mxu0 %v1296_v0  ;;  %v1050_v32 = vpack.c.bf16 %v479_v31, %v478_v30  ;;  %v559_v34 = vld [vmem:[#allocation6 + $0x8] sm:$0xff]  ;;  %v561_v37 = vld [vmem:[#allocation6 + $0x18] sm:$0xff]  ;;  %v562_v39 = vld [vmem:[#allocation6 + $0x20] sm:$0xff] }
  0x6e   : > { %1033 = vmatpush3.bf16.msra.mxu1 %v1032_v13  ;;  %v1053_v36 = vpack.c.bf16 %v559_v34, %v558_v33  ;;  %v1056_v38 = vpack.c.bf16 %v561_v37, %v560_v35  ;;  %v563_v40 = vld [vmem:[#allocation6 + $0x28] sm:$0xff]  ;;  %v564_v42 = vld [vmem:[#allocation6 + $0x30] sm:$0xff]  ;;  %v565_v43 = vld [vmem:[#allocation6 + $0x38] sm:$0xff] }
  0x6f   : > { %915 = vmatmul.mubr.msk.f32.vlgmr.msra.gmra.mrb[0].mxu0 %vm389_vm1, %v377_v16  ;;  %1034 = vmatprep.subr.bf16.mxu1 %v1296_v0  ;;  %v1059_v41 = vpack.c.bf16 %v563_v40, %v562_v39  ;;  %v1062_v44 = vpack.c.bf16 %v565_v43, %v564_v42  ;;  %v566_v45 = vld [vmem:[#allocation6 + $0x40] sm:$0xff]  ;;  %v567_v46 = vld [vmem:[#allocation6 + $0x48] sm:$0xff]  ;;  %v568_v48 = vld [vmem:[#allocation6 + $0x50] sm:$0xff] }
  0x70   : > { %984 = vmatprep.mubr.msk.f32.mxu0 %vm1297_vm0, %v1298_v1  ;;  %1054 = vmatpush3.bf16.msra.mxu0 %v1053_v36  ;;  %v1065_v47 = vpack.c.bf16 %v567_v46, %v566_v45  ;;  %v569_v49 = vld [vmem:[#allocation6 + $0x58] sm:$0xff]  ;;  %v570_v51 = vld [vmem:[#allocation6 + $0x60] sm:$0xff]  ;;  %v571_v52 = vld [vmem:[#allocation6 + $0x68] sm:$0xff] }
  0x71   : > { %1055 = vmatprep.subr.bf16.mxu0 %v1296_v0  ;;  %v1068_v50 = vpack.c.bf16 %v569_v49, %v568_v48  ;;  %v1071_v53 = vpack.c.bf16 %v571_v52, %v570_v51  ;;  %v843_v54 = vld [vmem:[%s1670_s2] ss:$0 sm:$0xff]  ;;  %v573_v60 = vld [vmem:[#allocation6 + $0x78] sm:$0xff]  ;;  %v654_v2 = vld [vmem:[%s1675_s7 + $0x10] sm:$0xff] }
  0x72   : > { %1036 = vmatpush3.bf16.msra.mxu1 %v1035_v17  ;;  %v572_v59 = vld [vmem:[#allocation6 + $0x70] sm:$0xff]  ;;  %v653_v63 = vld [vmem:[%s1675_s7 + $0x8] sm:$0xff]  ;;  %v658_v8 = vld [vmem:[%s1675_s7 + $0x30] sm:$0xff] }
  0x73   : > { %1037 = vmatprep.subr.bf16.mxu1 %v1296_v0  ;;  %v1074_v61 = vpack.c.bf16 %v573_v60, %v572_v59  ;;  %v652_v62 = vld [vmem:[%s1675_s7] sm:$0xff]  ;;  %v657_v6 = vld [vmem:[%s1675_s7 + $0x28] sm:$0xff]  ;;  %v659_v9 = vld [vmem:[%s1675_s7 + $0x38] sm:$0xff] }
  0x74   : > { %1057 = vmatpush3.bf16.msra.mxu0 %v1056_v38  ;;  %v1077_v3 = vpack.c.bf16 %v653_v63, %v652_v62  ;;  %v656_v5 = vld [vmem:[%s1675_s7 + $0x20] sm:$0xff]  ;;  %v1086_v10 = vpack.c.bf16 %v659_v9, %v658_v8  ;;  %v661_v12 = vld [vmem:[%s1675_s7 + $0x48] sm:$0xff]  ;;  %v662_v14 = vld [vmem:[%s1675_s7 + $0x50] sm:$0xff] }
  0x75   : > { %1058 = vmatprep.subr.bf16.mxu0 %v1296_v0  ;;  %v1083_v7 = vpack.c.bf16 %v657_v6, %v656_v5  ;;  %v660_v11 = vld [vmem:[%s1675_s7 + $0x40] sm:$0xff]  ;;  %v663_v15 = vld [vmem:[%s1675_s7 + $0x58] sm:$0xff]  ;;  %v665_v18 = vld [vmem:[%s1675_s7 + $0x68] sm:$0xff] }
  0x76   : > { %1039 = vmatpush3.bf16.msra.mxu1 %v1038_v20  ;;  %v1089_v13 = vpack.c.bf16 %v661_v12, %v660_v11  ;;  %v1092_v16 = vpack.c.bf16 %v663_v15, %v662_v14  ;;  %v664_v17 = vld [vmem:[%s1675_s7 + $0x60] sm:$0xff]  ;;  %v666_v25 = vld [vmem:[%s1675_s7 + $0x70] sm:$0xff] }
  0x77   : > { %1040 = vmatprep.subr.bf16.mxu1 %v1296_v0  ;;  %v1095_v19 = vpack.c.bf16 %v665_v18, %v664_v17  ;;  %v845_v20 = vld [vmem:[%s1672_s4] ss:$0 sm:$0xff] }
  0x78   : > { %1060 = vmatpush3.bf16.msra.mxu0 %v1059_v41  ;;  %v846_v27 = vld [vmem:[%s1674_s6] ss:$0 sm:$0xff] }
  0x79   : > { %1061 = vmatprep.subr.bf16.mxu0 %v1296_v0 }
  0x7a   : > { %1042 = vmatpush3.bf16.msra.mxu1 %v1041_v23 }
  0x7b   : > { %1043 = vmatprep.subr.bf16.mxu1 %v1296_v0 }
  0x7c   : > { %1063 = vmatpush3.bf16.msra.mxu0 %v1062_v44 }
  0x7d   : > { %1064 = vmatprep.subr.bf16.mxu0 %v1296_v0 }
  0x7e   : > { %1045 = vmatpush3.bf16.msra.mxu1 %v1044_v26  ;;  %v667_v26 = vld [vmem:[%s1675_s7 + $0x78] sm:$0xff] }
  0x7f   : > { %1046 = vmatprep.subr.bf16.mxu1 %v1296_v0 }
  0x80   : > { %1066 = vmatpush3.bf16.msra.mxu0 %v1065_v47 }
  0x81   : > { %1067 = vmatprep.subr.bf16.mxu0 %v1296_v0 }
  0x82   : > { %1048 = vmatpush3.bf16.msra.mxu1 %v1047_v29 }
  0x83   : > { %1049 = vmatprep.subr.bf16.mxu1 %v1296_v0 }
  0x84   : > { %1069 = vmatpush3.bf16.msra.mxu0 %v1068_v50 }
  0x85   : > { %1070 = vmatprep.subr.bf16.mxu0 %v1296_v0 }
  0x86   : > { %1051 = vmatpush3.bf16.msra.mxu1 %v1050_v32  ;;  %v847_v32 = vld [vmem:[%s1676_s8] ss:$0 sm:$0xff] }
  0x87   : > { %1076 = vmatprep.subr.bf16.mxu1 %v1296_v0 }
  0x88   : > { %1072 = vmatpush3.bf16.msra.mxu0 %v1071_v53 }
  0x89   : > { %1073 = vmatprep.subr.bf16.mxu0 %v1296_v0 }
  0x8c   : > { %1075 = vmatpush3.bf16.msra.mxu0 %v1074_v61 }
 0x142   : > { %v459_v55 = vpop.f32.mrb[0].mxu0 }
 0x143   : > { %v460_v56 = vadd.f32 %v843_v54, %v459_v55  ;;  %v916_v57 = vpop.f32.mrb[1].mxu0 }
 0x145   : > { %v463_v58 = vmax.f32 %v460_v56, 0.0 }
 0x147   : > { %950 = vmatmul.mubr.f32.vlgmr.msra.gmra.mrb[0].mxu1 %v463_v58 }
 0x148   : > { %1019 = vmatprep.mubr.msk.f32.mxu1 %vm1297_vm0, %v1298_v1  ;;  %v655_v1 = vld [vmem:[%s1675_s7 + $0x18] sm:$0xff]  ;;  %1078 = vmatpush3.bf16.msra.mxu1 %v1077_v3 }
 0x149   : > { %v1080_v4 = vpack.c.bf16 %v655_v1, %v654_v2  ;;  %1079 = vmatprep.subr.bf16.mxu1 %v1296_v0 }
 0x14c   : > { %1081 = vmatpush3.bf16.msra.mxu1 %v1080_v4 }
 0x14d   : > { %1082 = vmatprep.subr.bf16.mxu1 %v1296_v0 }
 0x150   : > { %1084 = vmatpush3.bf16.msra.mxu1 %v1083_v7 }
 0x151   : > { %1085 = vmatprep.subr.bf16.mxu1 %v1296_v0 }
 0x154   : > { %1087 = vmatpush3.bf16.msra.mxu1 %v1086_v10 }
 0x155   : > { %1088 = vmatprep.subr.bf16.mxu1 %v1296_v0 }
 0x158   : > { %1090 = vmatpush3.bf16.msra.mxu1 %v1089_v13 }
 0x159   : > { %1091 = vmatprep.subr.bf16.mxu1 %v1296_v0 }
 0x15c   : > { %1093 = vmatpush3.bf16.msra.mxu1 %v1092_v16 }
 0x15d   : > { %1094 = vmatprep.subr.bf16.mxu1 %v1296_v0 }
 0x160   : > { %1096 = vmatpush3.bf16.msra.mxu1 %v1095_v19 }
 0x161   : > { %1097 = vmatprep.subr.bf16.mxu1 %v1296_v0  ;;  %v1098_v0 = vpack.c.bf16 %v667_v26, %v666_v25 }
 0x164   : > { %1099 = vmatpush3.bf16.msra.mxu1 %v1098_v0 }
 0x21a   : > { %v553_v21 = vpop.f32.mrb[0].mxu1 }
 0x21b   : > { %v554_v22 = vadd.f32 %v845_v20, %v553_v21  ;;  %v951_v23 = vpop.f32.mrb[1].mxu1 }
 0x21d   : > { %v557_v24 = vmax.f32 %v554_v22, 0.0 }
 0x21f   : > { %985 = vmatmul.mubr.f32.vlgmr.msra.gmra.mrb[2].mxu0 %v557_v24 }
 0x2f2   : > { %v647_v28 = vpop.f32.mrb[2].mxu0 }
 0x2f3   : > { %v648_v29 = vadd.f32 %v846_v27, %v647_v28  ;;  %v986_v30 = vpop.f32.mrb[3].mxu0 }
 0x2f5   : > { %v651_v31 = vmax.f32 %v648_v29, 0.0 }
 0x2f7   : > { %1020 = vmatmul.mubr.f32.vlgmr.msra.gmra.mrb[2].mxu1 %v651_v31 }
 0x3ca   : > { %v741_v33 = vpop.f32.mrb[2].mxu1 }
 0x3cb   : > { %v742_v34 = vadd.f32 %v847_v32, %v741_v33  ;;  %v1021_v35 = vpop.f32.mrb[3].mxu1 }
 0x3cd   : > { %746 = vst.msk [vmem:[%s376_s20] sm:$0xff] %vm745_vm2, %v742_v34 }
 0x3ce PF: > { %p20_p9 = scmp.ge.s32.totalorder %s1442_s19, 4   ;;  %s1689_s30 = smov %s1281_s10 }
 0x3cf   : > { %s1690_s10 = smov %s1285_s11  ;;  %s1691_s11 = smov %s1453_s23 }
 0x3d0   : > { %s1692_s12 = smov %s1442_s19  ;;  %22 = sbr.rel (!%p20_p9) target bundleno = 4 (0x4), region = 104 }
 0x3d7   :  { %766 = vsyncpa [#allocation3], 1 }
 0x3d8   :  { %768 = vsyncpa [#allocation3 + $0x1], 1 }
 0x3d9   :  { %769 = vsyncpa [#allocation5], 1 }

</bundles_post_ra>
